<compile_context>
chip_gen: v5e
topology: v5e:2x2
jax: 0.10.0
libtpu: 0.0.40
codegen_flags: <defaults>
</compile_context>

<pallas_src>
import functools

import jax
import jax.numpy as jnp
from jax.experimental import pallas as pl
from jax.experimental.pallas import tpu as pltpu


# --------------------------------------------------------------------------
# Kernels
# --------------------------------------------------------------------------
def _fc_kernel_single_k(x_ref, w_ref, b_ref, o_ref, *, use_relu: bool):
    """Fast path: the whole K dimension fits in one tile (no accumulator)."""
    out = jnp.dot(x_ref[...], w_ref[...], preferred_element_type=jnp.float32)
    out = out + b_ref[...].astype(jnp.float32)
    if use_relu:
        out = jnp.maximum(out, 0.0)
    o_ref[...] = out.astype(o_ref.dtype)


def _fc_kernel_multi_k(x_ref, w_ref, b_ref, o_ref, acc_ref, *, use_relu: bool):
    """One (bm, tn) output tile accumulated over the K grid axis."""
    k = pl.program_id(2)

    @pl.when(k == 0)
    def _():
        acc_ref[...] = jnp.zeros_like(acc_ref)

    acc_ref[...] += jnp.dot(
        x_ref[...], w_ref[...], preferred_element_type=jnp.float32)

    # Bias + ReLU only in the epilogue — VPU work rides free under MXU/DMA
    # and is not repeated per reduction step.
    @pl.when(k == pl.num_programs(2) - 1)
    def _():
        out = acc_ref[...] + b_ref[...].astype(jnp.float32)
        if use_relu:
            out = jnp.maximum(out, 0.0)
        o_ref[...] = out.astype(o_ref.dtype)


# --------------------------------------------------------------------------
# Tiling helpers
# --------------------------------------------------------------------------
def _round_up(x, m):
    return ((x + m - 1) // m) * m


def _sublane_multiple(dtype):
    """Second-to-last-dim tile multiple for a packed dtype (8/16/32)."""
    isz = jnp.dtype(dtype).itemsize
    if isz >= 4:
        return 8
    if isz == 2:
        return 16
    return 32


def _vmem_cap_bytes():
    """Physical VMEM per TensorCore minus ~15% headroom for compiler scratch."""
    try:
        phys = pltpu.get_tpu_info().vmem_capacity_bytes
    except Exception:  # interpret mode / older jax: assume the smallest (v7x)
        phys = 64 * 2**20
    return int(phys * 0.85)


def _pick_k_tile(k, max_tk):
    """Return (tk, k_padded).

    Full K if small; else the largest 128-multiple divisor <= max_tk (no
    padding); else a 128-multiple tile and K zero-padded up to a multiple of
    it.  Zero-padding K is numerically exact for matmul and keeps VMEM tiles
    bounded (the old "keep full K resident" fallback could blow v7x's 64 MiB).
    """
    if k <= max_tk:
        return k, k
    best = max(max_tk - max_tk % 128, 128)
    for tk in range(best, 127, -128):
        if k % tk == 0:
            return tk, k
    return best, _round_up(k, best)


# --------------------------------------------------------------------------
# Public forward
# --------------------------------------------------------------------------
def fc_forward(x, w, b, *, use_relu=True, dropout_r=0.0,
               block_m=512, block_n=512, block_k=2048, compute_dtype="auto"):
    """Pallas implementation of FC.forward (inference / eval mode).

    x: [..., in_size]; w: [in_size, out_size]; b: [out_size].
    compute_dtype: "auto" casts f32 operands to bf16 for the MXU (f32
    accumulation, output keeps x.dtype); pass None to force full-precision
    operands, or an explicit dtype.
    """
    # TODO(synk): training-mode dropout (nn.Dropout) not implemented; in eval
    # mode (and for dropout_r == 0) it is the identity, which is what we do.
    del dropout_r

    in_size = x.shape[-1]
    out_size = w.shape[-1]
    lead_shape = x.shape[:-1]
    out_dtype = x.dtype

    x2 = x.reshape(-1, in_size)
    m = x2.shape[0]

    if compute_dtype == "auto":
        compute_dtype = jnp.bfloat16 if x.dtype == jnp.float32 else None
    if compute_dtype is not None:
        if x2.dtype != compute_dtype:
            x2 = x2.astype(compute_dtype)
        if w.dtype != compute_dtype:
            # NOTE: prefer storing/passing the weight already in compute_dtype
            # so this per-call HBM cast pass is not paid on every forward.
            w = w.astype(compute_dtype)

    b2 = b.reshape(1, out_size)

    # ---- Tile sizes (128-aligned where possible, clamped to the problem) ----
    sub = _sublane_multiple(x2.dtype)                # 8 f32 / 16 bf16 / 32 i8
    bm = min(block_m, _round_up(m, sub))
    tn = out_size if out_size <= block_n else block_n    # full dim or 128-mult
    tk, k_pad = _pick_k_tile(in_size, block_k)           # full dim or 128-mult

    gm = pl.cdiv(m, bm)
    gn = pl.cdiv(out_size, tn)

    # v7x megacore: guarantee >= 2 parallel (M, N) blocks when the shape allows
    # so both TensorCores get work; harmless on single-TC chips.
    if gm * gn == 1:
        if out_size >= 256:
            tn = _round_up(pl.cdiv(out_size, 2), 128)
            gn = pl.cdiv(out_size, tn)
        elif m >= 2 * sub:
            bm = _round_up(pl.cdiv(m, 2), sub)
            gm = pl.cdiv(m, bm)

    gk = k_pad // tk

    # Zero-pad K (exact for matmul) only when no clean 128-mult divisor exists.
    if k_pad != in_size:
        x2 = jnp.pad(x2, ((0, 0), (0, k_pad - in_size)))
        w = jnp.pad(w, ((0, k_pad - in_size), (0, 0)))

    # ---- VMEM budget (double-buffered tiles + optional f32 accumulator) ----
    in_isz = jnp.dtype(x2.dtype).itemsize
    out_isz = jnp.dtype(out_dtype).itemsize
    acc_bytes = 0 if gk == 1 else bm * tn * 4
    vmem_needed = (2 * (bm * tk + tk * tn + tn) * in_isz
                   + 2 * bm * tn * out_isz
                   + acc_bytes)
    vmem_limit = int(min(max(32 * 2**20, 2 * vmem_needed), _vmem_cap_bytes()))

    cost = pl.CostEstimate(
        flops=2 * m * k_pad * out_size,
        transcendentals=0,
        bytes_accessed=(m * k_pad * in_isz
                        + k_pad * out_size * in_isz
                        + out_size * in_isz
                        + m * out_size * out_isz),
    )

    if gk == 1:
        # Fast path: no accumulator scratch, no reduction axis.
        out = pl.pallas_call(
            functools.partial(_fc_kernel_single_k, use_relu=use_relu),
            out_shape=jax.ShapeDtypeStruct((m, out_size), out_dtype),
            grid_spec=pltpu.PrefetchScalarGridSpec(
                num_scalar_prefetch=0,
                grid=(gm, gn),
                in_specs=[
                    pl.BlockSpec((bm, tk), lambda i, j: (i, 0)),
                    pl.BlockSpec((tk, tn), lambda i, j: (0, j)),
                    pl.BlockSpec((1, tn), lambda i, j: (0, j)),
                ],
                out_specs=pl.BlockSpec((bm, tn), lambda i, j: (i, j)),
            ),
            compiler_params=pltpu.CompilerParams(
                dimension_semantics=("parallel", "parallel"),
                vmem_limit_bytes=vmem_limit,
            ),
            cost_estimate=cost,
        )(x2, w, b2)
    else:
        out = pl.pallas_call(
            functools.partial(_fc_kernel_multi_k, use_relu=use_relu),
            out_shape=jax.ShapeDtypeStruct((m, out_size), out_dtype),
            grid_spec=pltpu.PrefetchScalarGridSpec(
                num_scalar_prefetch=0,
                grid=(gm, gn, gk),
                in_specs=[
                    pl.BlockSpec((bm, tk), lambda i, j, k: (i, k)),
                    pl.BlockSpec((tk, tn), lambda i, j, k: (k, j)),
                    pl.BlockSpec((1, tn), lambda i, j, k: (0, j)),
                ],
                out_specs=pl.BlockSpec((bm, tn), lambda i, j, k: (i, j)),
                scratch_shapes=[pltpu.VMEM((bm, tn), jnp.float32)],
            ),
            compiler_params=pltpu.CompilerParams(
                dimension_semantics=("parallel", "parallel", "arbitrary"),
                vmem_limit_bytes=vmem_limit,
            ),
            cost_estimate=cost,
        )(x2, w, b2)

    return out.reshape(*lead_shape, out_size)


def init_fc_params(key, in_size, out_size, dtype=jnp.float32):
    """Deterministic init mimicking nn.Linear's default (uniform ±1/sqrt(in))."""
    kw, kb = jax.random.split(key)
    bound = 1.0 / (in_size ** 0.5)
    # Stored as [in_size, out_size] (transpose of PyTorch layout).
    w = jax.random.uniform(kw, (in_size, out_size), dtype, -bound, bound)
    b = jax.random.uniform(kb, (out_size,), dtype, -bound, bound)
    return w, b


if __name__ == "__main__":
    batch, seq, in_size, out_size = 2, 8, 32, 64

    key = jax.random.PRNGKey(0)
    kx, kp = jax.random.split(key)
    x = jax.random.normal(kx, (batch, seq, in_size), jnp.float32)
    w, b = init_fc_params(kp, in_size, out_size)

    # Persist the weight in bf16 once (best practice: avoids a per-call
    # wrapper cast pass over the full weight).
    w_bf16 = w.astype(jnp.bfloat16)

    y = fc_forward(x, w_bf16, b, use_relu=True, dropout_r=0.0)
    y = jax.block_until_ready(y)

    # Reference with the same numerics (bf16 operands, f32 accumulation).
    y_ref = jnp.maximum(
        jnp.dot(x.astype(jnp.bfloat16), w_bf16,
                preferred_element_type=jnp.float32) + b, 0.0)

    assert y.shape == (batch, seq, out_size)
    assert y.dtype == x.dtype
    assert jnp.allclose(y, y_ref, atol=1e-3, rtol=1e-3), float(
        jnp.max(jnp.abs(y - y_ref)))

    print("KERNEL_OK")
</pallas_src>

<mosaic_0001>
module attributes {stable_mosaic.version = 11 : i64} {
  func.func @_fc_kernel_single_k(%arg0: i32, %arg1: i32, %arg2: memref<16x32xbf16, #tpu.memory_space<vmem>>, %arg3: memref<32x64xbf16, #tpu.memory_space<vmem>>, %arg4: memref<1x64xf32, #tpu.memory_space<vmem>>, %arg5: memref<16x64xf32, #tpu.memory_space<vmem>>) attributes {dimension_semantics = [#tpu.dimension_semantics<parallel>, #tpu.dimension_semantics<parallel>], iteration_bounds = array<i64: 1, 1>, scalar_prefetch = 0 : i64, scratch_operands = 0 : i64, tpu.core_type = #tpu.core_type<tc>, window_params = [{transform_indices = @transform_0, window_bounds = array<i64: 16, 32>}, {transform_indices = @transform_1, window_bounds = array<i64: 32, 64>}, {transform_indices = @transform_2, window_bounds = array<i64: 1, 64>}, {transform_indices = @transform_3, window_bounds = array<i64: 16, 64>}]} {
    %c0 = arith.constant 0 : index
    %c0_0 = arith.constant 0 : index
    %0 = vector.load %arg2[%c0, %c0_0] : memref<16x32xbf16, #tpu.memory_space<vmem>>, vector<16x32xbf16>
    %c0_1 = arith.constant 0 : index
    %c0_2 = arith.constant 0 : index
    %1 = vector.load %arg3[%c0_1, %c0_2] : memref<32x64xbf16, #tpu.memory_space<vmem>>, vector<32x64xbf16>
    %cst = arith.constant dense<0.000000e+00> : vector<16x64xf32>
    %2 = tpu.matmul %0, %1, %cst {dimension_numbers = #tpu.dot_dimension_numbers<[1], [0], [0], [1], [0, 0, 1, 1], [], []>} : vector<16x32xbf16>, vector<32x64xbf16>, vector<16x64xf32> -> vector<16x64xf32>
    %c0_3 = arith.constant 0 : index
    %c0_4 = arith.constant 0 : index
    %3 = vector.load %arg4[%c0_3, %c0_4] : memref<1x64xf32, #tpu.memory_space<vmem>>, vector<1x64xf32>
    %4 = vector.broadcast %3 : vector<1x64xf32> to vector<16x64xf32>
    %5 = arith.addf %2, %4 : vector<16x64xf32>
    %cst_5 = arith.constant 0.000000e+00 : f32
    %6 = vector.broadcast %cst_5 : f32 to vector<16x64xf32>
    %7 = arith.maximumf %5, %6 : vector<16x64xf32>
    %c0_6 = arith.constant 0 : index
    %c0_7 = arith.constant 0 : index
    %8 = vector.load %arg5[%c0_6, %c0_7] : memref<16x64xf32, #tpu.memory_space<vmem>>, vector<16x64xf32>
    tpu.vector_store %arg5[%c0_6, %c0_7], %7 {strides = array<i32>} : memref<16x64xf32, #tpu.memory_space<vmem>>, vector<16x64xf32>,
    return
  }
  func.func @transform_0(%arg0: i32, %arg1: i32) -> (i32, i32) {
    %c0_i32 = arith.constant 0 : i32
    %c0_i32_0 = arith.constant 0 : i32
    return %arg0, %c0_i32 : i32, i32
  }
  func.func @transform_1(%arg0: i32, %arg1: i32) -> (i32, i32) {
    %c0_i32 = arith.constant 0 : i32
    %c0_i32_0 = arith.constant 0 : i32
    return %c0_i32, %arg1 : i32, i32
  }
  func.func @transform_2(%arg0: i32, %arg1: i32) -> (i32, i32) {
    %c0_i32 = arith.constant 0 : i32
    %c0_i32_0 = arith.constant 0 : i32
    return %c0_i32, %arg1 : i32, i32
  }
  func.func @transform_3(%arg0: i32, %arg1: i32) -> (i32, i32) {
    %c0_i32 = arith.constant 0 : i32
    return %arg0, %arg1 : i32, i32
  }
}

</mosaic_0001>

<bundles_post_ra>
// kernel: tpu_custom_call.1
= control target key start
LH: loop header
LB: loop body
LE: loop exit
PB: predicated region body
PF: predicated region fallthrough
CT: control target
= control target key end

     0   :  { %8 = vsyncpa [#allocation3], 0  ;;  %s259_s0 = inlined_call_operand.hbm [shape: bf16[16,32], index: 0, kind: input, shape index: {}]   ;;  %s260_s1 = inlined_call_operand.hbm [shape: bf16[32,64], index: 1, kind: input, shape index: {}]   ;;  %s261_s2 = inlined_call_operand.vmem [shape: f32[1,64], index: 2, kind: input, shape index: {}]   ;;  %s262_s3 = inlined_call_operand.hbm [shape: f32[16,64], index: 3, kind: output, shape index: {}]  }
   0x1   :  { %9 = vsyncpa [#allocation6], 0 }
   0x2   :  { %10 = vsyncpa [#allocation4], 0  ;;  %s15_s14 = sshll.u32 %s259_s0, 4  ;;  %s220_s15 = smov [#allocation2]   ;;  %s16_s14 = int_to_ptr.hbm [resolvable:$true] %s15_s14 }
   0x3   :  { %s17_s16 = sshll.u32 %s220_s15, 4  ;;  %s28_s19 = sshll.u32 %s260_s1, 4  ;;  %s18_s16 = int_to_ptr.vmem [resolvable:$true] %s17_s16  ;;  %s29_s19 = int_to_ptr.hbm [resolvable:$true] %s28_s19 }
   0x4   :  { %s221_s20 = smov 64   ;;  %s222_s21 = smov 4  }
   0x5   :  { %23 = dma.hbm_to_vmem [thread:$0]  %s16_s14, 128, %s18_s16, [#allocation3], %s221_s20, %s221_s20, %s222_s21  }
   0x6   :  { %s223_s22 = smov [#allocation5]  }
   0x7   :  { %s30_s23 = sshll.u32 %s223_s22, 4  ;;  %s31_s23 = int_to_ptr.vmem [resolvable:$true] %s30_s23 }
   0x8   :  { %36 = dma.hbm_to_vmem [thread:$0]  %s29_s19, 256, %s31_s23, [#allocation6], %s221_s20, %s221_s20, %s222_s21  }
   0x9   :  { %214 = dma.done.wait [#allocation3], 128  }
   0xa   :  { %215 = vsyncadd [#allocation3], 4294967168 }
   0xb   :  { %216 = dma.done.wait [#allocation6], 256  }
   0xc   :  { %217 = vsyncadd [#allocation6], 4294967040  ;;  %v133_v0 = vld [vmem:[#allocation5 + $0x8] sm:$0xff]  ;;  %v132_v1 = vld [vmem:[#allocation5] sm:$0xff]  ;;  %vm75_vm0 = vcmask 261120   ;;  %vm95_vm1 = vcmask 523264  }
   0xd   :  { %85 = vmatpush.bf16.msra.mxu0 %v133_v0  ;;  %v131_v2 = vld [vmem:[#allocation2] sm:$0xff]  ;;  %s224_s24 = smov [#allocation7]   ;;  %s104_s28 = sshll.u32 %s262_s3, 4  ;;  %s105_s28 = int_to_ptr.hbm [resolvable:$true] %s104_s28 }
   0xe   :  { %v141_v3 = vld [vmem:[%s261_s2] ss:$0 sm:$0xff]  ;;  %s102_s25 = sshll.u32 %s224_s24, 4  ;;  %s225_s29 = smov 128   ;;  %s103_s25 = int_to_ptr.vmem [resolvable:$true] %s102_s25 }
   0xf   :  { %s226_s30 = smov 8  }
  0x11   :  { %86 = vmatpush.bf16.msra.mxu0 %v132_v1 }
  0x14   :  { %130 = vmatmul.msk.bf16.vlgmr.msra.gmra.mxu0 %vm75_vm0, %v131_v2 }
  0x91   :  { %v88_v4 = vpop.f32.mrf.mxu0 }
  0x92   :  { %v89_v5 = vadd.f32 %v141_v3, %v88_v4 }
  0x94   :  { %v93_v6 = vmax.f32 %v89_v5, 0.0 }
  0x96   :  { %96 = vst.msk [vmem:[#allocation7] sm:$0xff] %vm95_vm1, %v93_v6 }
  0x99   :  { %v90_v7 = vpop.f32.mrf.mxu0 }
  0x9a   :  { %v91_v8 = vadd.f32 %v141_v3, %v90_v7 }
  0x9c   :  { %v94_v9 = vmax.f32 %v91_v8, 0.0 }
  0x9e   :  { %97 = vst.msk [vmem:[#allocation7 + $0x8] sm:$0xff] %vm95_vm1, %v94_v9 }
  0x9f   :  { %110 = dma.vmem_to_hbm [thread:$0]  %s103_s25, 256, %s105_s28, [#allocation4], %s225_s29, %s225_s29, %s226_s30  }
  0xa0   :  { %218 = dma.done.wait [#allocation4], 256  }
  0xa1   :  { %219 = vsyncadd [#allocation4], 4294967040 }
  0xa2   :  { %115 = vsyncpa [#allocation3], 1 }
  0xa3   :  { %116 = vsyncpa [#allocation6], 1 }
  0xa4   :  { %117 = vsyncpa [#allocation4], 1 }

</bundles_post_ra>
